<compile_context>
chip_gen: v5e
topology: v5e:2x2
jax: 0.10.0
libtpu: 0.0.40
codegen_flags: <defaults>
</compile_context>

<pallas_src>
import functools

import jax
import jax.numpy as jnp
from jax.experimental import pallas as pl
from jax.experimental.pallas import tpu as pltpu


def _linear_kernel(x_ref, w_ref, b_ref, o_ref):
    # x_ref: (TM, K), w_ref: (K, N), b_ref: (1, N), o_ref: (TM, N)
    acc = jnp.dot(x_ref[...], w_ref[...], preferred_element_type=jnp.float32)
    o_ref[...] = (acc + b_ref[...]).astype(o_ref.dtype)


@functools.partial(jax.jit, static_argnames=("tm_cap",))
def linear_pallas(x, w, b, *, tm_cap=2048):
    """y = x @ w + b.

    x: (B, S, K) float32, w: (K, N), b: (N,). Returns (B, S, N).
    """
    B, S, K = x.shape
    N = w.shape[1]
    M = B * S

    # Keep tm_cap a multiple of 8 (sublane rule for non-full blocks).
    tm_cap = max(8, (int(tm_cap) // 8) * 8)

    if M <= tm_cap:
        # Fast path (covers the real model shape M=4): one full-extent block,
        # exempt from the (8,128) divisibility rule -> no padding at all.
        tm = M
        num_tiles = 1
    else:
        num_tiles = -(-M // tm_cap)
        if num_tiles % 2 == 1:
            # v7x megacore: prefer an even tile count so both TCs get work.
            num_tiles += 1
        tm = -(-M // num_tiles)
        tm = -(-tm // 8) * 8          # multiple of 8 sublanes
        num_tiles = -(-M // tm)       # ragged last tile handled by Pallas

    x2d = x.reshape(M, K)             # free, contiguous reshape
    b2d = b.reshape(1, N)             # free metadata reshape

    out = pl.pallas_call(
        _linear_kernel,
        out_shape=jax.ShapeDtypeStruct((M, N), x.dtype),
        grid_spec=pl.GridSpec(
            grid=(num_tiles,),
            in_specs=[
                pl.BlockSpec((tm, K), lambda i: (i, 0)),   # x tile (pipelined)
                pl.BlockSpec((K, N), lambda i: (0, 0)),    # W resident
                pl.BlockSpec((1, N), lambda i: (0, 0)),    # bias resident
            ],
            out_specs=pl.BlockSpec((tm, N), lambda i: (i, 0)),
        ),
        compiler_params=pltpu.CompilerParams(
            dimension_semantics=("parallel",),
        ),
    )(x2d, w, b2d)

    return out.reshape(B, S, N)


if __name__ == "__main__":
    # Model: self.proj = nn.Linear(in_features=20, hidden_size=32)
    B, S, D_IN, HIDDEN = 1, 4, 20, 32

    key = jax.random.PRNGKey(0)
    kx, kw, kb = jax.random.split(key, 3)

    x = jax.random.normal(kx, (B, S, D_IN), dtype=jnp.float32)
    # Deterministic parameter init (mimics nn.Linear uniform bound 1/sqrt(fan_in))
    bound = 1.0 / (D_IN ** 0.5)
    w = jax.random.uniform(kw, (D_IN, HIDDEN), minval=-bound, maxval=bound,
                           dtype=jnp.float32)
    b = jax.random.uniform(kb, (HIDDEN,), minval=-bound, maxval=bound,
                           dtype=jnp.float32)

    y = linear_pallas(x, w, b)
    jax.block_until_ready(y)

    # Correctness check against plain JAX reference.
    y_ref = jnp.einsum("bsk,kn->bsn", x, w) + b
    assert y.shape == (B, S, HIDDEN)
    assert jnp.allclose(y, y_ref, atol=1e-5, rtol=1e-5)

    # Sanity-check the tiled (large-M) path with ragged last tile:
    # M = 6000 -> 4 tiles of 1504 rows (even tile count, last tile ragged).
    B2, S2 = 4, 1500
    x_big = jax.random.normal(jax.random.PRNGKey(1), (B2, S2, D_IN),
                              dtype=jnp.float32)
    y_big = linear_pallas(x_big, w, b)
    jax.block_until_ready(y_big)
    y_big_ref = jnp.einsum("bsk,kn->bsn", x_big, w) + b
    assert jnp.allclose(y_big, y_big_ref, atol=1e-4, rtol=1e-4)

    print("KERNEL_OK")
</pallas_src>

<mosaic_0001>
module attributes {stable_mosaic.version = 11 : i64} {
  func.func @_linear_kernel(%arg0: i32, %arg1: memref<4x20xf32, #tpu.memory_space<vmem>>, %arg2: memref<20x32xf32, #tpu.memory_space<vmem>>, %arg3: memref<1x32xf32, #tpu.memory_space<vmem>>, %arg4: memref<4x32xf32, #tpu.memory_space<vmem>>) attributes {dimension_semantics = [#tpu.dimension_semantics<parallel>], iteration_bounds = array<i64: 1>, scalar_prefetch = 0 : i64, scratch_operands = 0 : i64, tpu.core_type = #tpu.core_type<tc>, window_params = [{transform_indices = @transform_0, window_bounds = array<i64: 4, 20>}, {pipeline_mode = #tpu.pipeline_mode<synchronous>, transform_indices = @transform_1, window_bounds = array<i64: 20, 32>}, {pipeline_mode = #tpu.pipeline_mode<synchronous>, transform_indices = @transform_2, window_bounds = array<i64: 1, 32>}, {transform_indices = @transform_3, window_bounds = array<i64: 4, 32>}]} {
    %c0 = arith.constant 0 : index
    %c0_0 = arith.constant 0 : index
    %0 = vector.load %arg1[%c0, %c0_0] : memref<4x20xf32, #tpu.memory_space<vmem>>, vector<4x20xf32>
    %c0_1 = arith.constant 0 : index
    %c0_2 = arith.constant 0 : index
    %1 = vector.load %arg2[%c0_1, %c0_2] : memref<20x32xf32, #tpu.memory_space<vmem>>, vector<20x32xf32>
    %cst = arith.constant dense<0.000000e+00> : vector<4x32xf32>
    %2 = tpu.matmul %0, %1, %cst {dimension_numbers = #tpu.dot_dimension_numbers<[1], [0], [0], [1], [0, 0, 1, 1], [], []>} : vector<4x20xf32>, vector<20x32xf32>, vector<4x32xf32> -> vector<4x32xf32>
    %c0_3 = arith.constant 0 : index
    %c0_4 = arith.constant 0 : index
    %3 = vector.load %arg3[%c0_3, %c0_4] : memref<1x32xf32, #tpu.memory_space<vmem>>, vector<1x32xf32>
    %4 = vector.broadcast %3 : vector<1x32xf32> to vector<4x32xf32>
    %5 = arith.addf %2, %4 : vector<4x32xf32>
    %c0_5 = arith.constant 0 : index
    %c0_6 = arith.constant 0 : index
    %6 = vector.load %arg4[%c0_5, %c0_6] : memref<4x32xf32, #tpu.memory_space<vmem>>, vector<4x32xf32>
    tpu.vector_store %arg4[%c0_5, %c0_6], %5 {strides = array<i32>} : memref<4x32xf32, #tpu.memory_space<vmem>>, vector<4x32xf32>,
    return
  }
  func.func @transform_0(%arg0: i32) -> (i32, i32) {
    %c0_i32 = arith.constant 0 : i32
    %c0_i32_0 = arith.constant 0 : i32
    return %arg0, %c0_i32 : i32, i32
  }
  func.func @transform_1(%arg0: i32) -> (i32, i32) {
    %c0_i32 = arith.constant 0 : i32
    %c0_i32_0 = arith.constant 0 : i32
    %c0_i32_1 = arith.constant 0 : i32
    return %c0_i32, %c0_i32_0 : i32, i32
  }
  func.func @transform_2(%arg0: i32) -> (i32, i32) {
    %c0_i32 = arith.constant 0 : i32
    %c0_i32_0 = arith.constant 0 : i32
    %c0_i32_1 = arith.constant 0 : i32
    return %c0_i32, %c0_i32_0 : i32, i32
  }
  func.func @transform_3(%arg0: i32) -> (i32, i32) {
    %c0_i32 = arith.constant 0 : i32
    %c0_i32_0 = arith.constant 0 : i32
    return %arg0, %c0_i32 : i32, i32
  }
}

</mosaic_0001>

<bundles_post_ra>
// kernel: linear_pallas.1
= control target key start
LH: loop header
LB: loop body
LE: loop exit
PB: predicated region body
PF: predicated region fallthrough
CT: control target
= control target key end

     0   :  { %8 = vsyncpa [#allocation3], 0  ;;  %s224_s0 = inlined_call_operand.hbm [shape: f32[4,20], index: 0, kind: input, shape index: {}]   ;;  %s225_s1 = inlined_call_operand.hbm [shape: f32[20,32], index: 1, kind: input, shape index: {}]   ;;  %s226_s2 = inlined_call_operand.vmem [shape: f32[1,32], index: 2, kind: input, shape index: {}]   ;;  %s227_s3 = inlined_call_operand.hbm [shape: f32[4,32], index: 3, kind: output, shape index: {}]  }
   0x1   :  { %9 = vsyncpa [#allocation6], 0 }
   0x2   :  { %10 = vsyncpa [#allocation4], 0  ;;  %s16_s14 = sshll.u32 %s224_s0, 4  ;;  %s187_s15 = smov [#allocation2]   ;;  %s17_s14 = int_to_ptr.hbm [resolvable:$true] %s16_s14 }
   0x3   :  { %s18_s16 = sshll.u32 %s187_s15, 4  ;;  %s26_s19 = sshll.u32 %s225_s1, 4  ;;  %s19_s16 = int_to_ptr.vmem [resolvable:$true] %s18_s16  ;;  %s27_s19 = int_to_ptr.hbm [resolvable:$true] %s26_s19 }
   0x4   :  { %21 = dma.hbm_to_vmem [thread:$0]  %s17_s14, 64, %s19_s16, [#allocation3]  }
   0x5   :  { %s188_s20 = smov [#allocation5]   ;;  %s189_s22 = smov 128  }
   0x6   :  { %s28_s21 = sshll.u32 %s188_s20, 4  ;;  %s190_s23 = smov 8   ;;  %s29_s21 = int_to_ptr.vmem [resolvable:$true] %s28_s21 }
   0x7   :  { %34 = dma.hbm_to_vmem [thread:$0]  %s27_s19, 384, %s29_s21, [#allocation6], %s189_s22, %s189_s22, %s190_s23  }
   0x8   :  { %181 = dma.done.wait [#allocation3], 64  }
   0x9   :  { %182 = vsyncadd [#allocation3], 4294967232 }
   0xa   :  { %183 = dma.done.wait [#allocation6], 384  }
   0xb   :  { %184 = vsyncadd [#allocation6], 4294966912  ;;  %vm57_vm0 = vcmask 1043456   ;;  %v48_v0 = vld [vmem:[#allocation5 + $0x10] sm:$0xf]  ;;  %v47_v1 = vld [vmem:[#allocation5 + $0x8] sm:$0xff] }
   0xc   :  { %101 = vmatpush.msk.msra.mxu0 %vm57_vm0, %v48_v0  ;;  %v46_v2 = vld [vmem:[#allocation5] sm:$0xff]  ;;  %v45_v3 = vld [vmem:[#allocation2] sm:$0xf]  ;;  %vm53_vm1 = vcmask 162816   ;;  %s191_s24 = smov [#allocation7]   ;;  %s90_s28 = sshll.u32 %s227_s3, 4  ;;  %s91_s28 = int_to_ptr.hbm [resolvable:$true] %s90_s28 }
   0xd   :  { %v108_v4 = vld [vmem:[%s226_s2] ss:$0 sm:$0xff]  ;;  %s88_s25 = sshll.u32 %s191_s24, 4  ;;  %vm81_vm2 = vcmask 257024   ;;  %s89_s25 = int_to_ptr.vmem [resolvable:$true] %s88_s25 }
   0xe   :  { %75 = vmatpush.msra.mxu0 %v47_v1 }
  0x10   :  { %76 = vmatpush.msra.mxu0 %v46_v2 }
  0x11   :  { %102 = vmatmul.msk.f32.vlgmr.msra.gmra.mxu0 %vm53_vm1, %v45_v3 }
  0x8e   :  { %v78_v5 = vpop.f32.mrf.mxu0 }
  0x8f   :  { %v79_v6 = vadd.f32 %v108_v4, %v78_v5 }
  0x91   :  { %82 = vst.msk [vmem:[#allocation7] sm:$0xf] %vm81_vm2, %v79_v6 }
  0x92   :  { %93 = dma.vmem_to_hbm [thread:$0]  %s89_s25, 64, %s91_s28, [#allocation4]  }
  0x93   :  { %185 = dma.done.wait [#allocation4], 64  }
  0x94   :  { %186 = vsyncadd [#allocation4], 4294967232 }
  0x95   :  { %98 = vsyncpa [#allocation3], 1 }
  0x96   :  { %99 = vsyncpa [#allocation6], 1 }
  0x97   :  { %100 = vsyncpa [#allocation4], 1 }

</bundles_post_ra>
